<compile_context>
chip_gen: v5e
topology: v5e:2x2
jax: 0.10.0
libtpu: 0.0.40
codegen_flags: <defaults>
</compile_context>

<pallas_src>
import functools

import jax
import jax.numpy as jnp
from jax import lax
from jax.experimental import pallas as pl
from jax.experimental.pallas import tpu as pltpu

EPS = 1e-5


def _resblock_fused_kernel(x_ref, gamma_ref, beta_ref, w_ref, b_ref, o_ref,
                           h_ref, *, matmul_dtype):
    """All `depth` (BN -> ReLU -> Linear) layers fused; grid axis 0 = layer index.

    x_ref     : [N, D]    block input (residual branch); DMA'd once (constant index map)
    gamma_ref : [1, D]    this layer's BN scale
    beta_ref  : [1, D]    this layer's BN shift
    w_ref     : [1, D, D] this layer's Linear weight, PyTorch (out, in) layout
    b_ref     : [1, D]    this layer's Linear bias
    o_ref     : [N, D]    final output; written only on the last layer step
    h_ref     : [N, D]    f32 VMEM scratch carrying the hidden state across layers
    """
    layer = pl.program_id(0)
    n_layers = pl.num_programs(0)

    @pl.when(layer == 0)
    def _():
        h_ref[...] = x_ref[...].astype(jnp.float32)

    h = h_ref[...]                       # f32 [N, D]
    n = h.shape[0]
    inv_n = 1.0 / n

    # --- BatchNorm1d (training mode): one-pass batch stats, biased variance ---
    mean = jnp.sum(h, axis=0, keepdims=True) * inv_n            # [1, D]
    mean_sq = jnp.sum(h * h, axis=0, keepdims=True) * inv_n     # [1, D]
    var = jnp.maximum(mean_sq - mean * mean, 0.0)               # clamp for stability
    inv_std = lax.rsqrt(var + EPS)
    scale = gamma_ref[...] * inv_std                            # [1, D]
    shift = beta_ref[...] - mean * scale                        # [1, D]
    h = h * scale + shift                                       # normalize + affine

    # --- Activation (ReLU) ---
    h = jnp.maximum(h, 0.0)

    # --- Linear: h @ W.T + b ; contract h axis 1 against W axis 1 (no transpose) ---
    w = w_ref[0]                                                # [D_out, D_in]
    y = lax.dot_general(
        h.astype(matmul_dtype), w.astype(matmul_dtype),
        dimension_numbers=(((1,), (1,)), ((), ())),
        preferred_element_type=jnp.float32,
    ) + b_ref[...]                                              # f32 [N, D]

    h_ref[...] = y                                              # carry to next layer

    @pl.when(layer == n_layers - 1)
    def _():
        o_ref[...] = (y + x_ref[...].astype(jnp.float32)).astype(o_ref.dtype)


def resblock_forward(x, params, *, matmul_dtype=jnp.float32):
    """params: list of (gamma[D], beta[D], W[D,D], b[D]) per layer (depth entries).

    matmul_dtype=jnp.bfloat16 enables the fast MXU path on v6e/v7x (f32 accumulation);
    BN / bias / residual math is always f32.
    """
    N, D = x.shape
    depth = len(params)
    gamma = jnp.stack([p[0] for p in params]).reshape(depth, D)
    beta = jnp.stack([p[1] for p in params]).reshape(depth, D)
    w = jnp.stack([p[2] for p in params]).reshape(depth, D, D)   # PyTorch (out, in) layout
    b = jnp.stack([p[3] for p in params]).reshape(depth, D)

    # Explicit scoped-VMEM budget: x + out (single-buffered, constant index),
    # h scratch, and double-buffered per-layer params.  Clamped to a range that
    # is safe on v5e (16 MiB default scoped) through v7x (64 MiB physical).
    per_layer_bytes = 4 * (D * D + 3 * D) * 2
    io_bytes = 4 * (2 * N * D)
    scratch_bytes = 4 * N * D
    vmem_limit = max(16 << 20, min(2 * (per_layer_bytes + io_bytes + scratch_bytes),
                                   48 << 20))

    kernel = functools.partial(_resblock_fused_kernel, matmul_dtype=matmul_dtype)
    return pl.pallas_call(
        kernel,
        out_shape=jax.ShapeDtypeStruct((N, D), x.dtype),
        grid=(depth,),
        in_specs=[
            pl.BlockSpec((N, D), lambda l: (0, 0)),        # x (residual, DMA'd once)
            pl.BlockSpec((1, D), lambda l: (l, 0)),        # gamma  (per-layer slice)
            pl.BlockSpec((1, D), lambda l: (l, 0)),        # beta
            pl.BlockSpec((1, D, D), lambda l: (l, 0, 0)),  # W
            pl.BlockSpec((1, D), lambda l: (l, 0)),        # bias
        ],
        out_specs=pl.BlockSpec((N, D), lambda l: (0, 0)),
        scratch_shapes=[pltpu.VMEM((N, D), jnp.float32)],  # resident hidden state
        compiler_params=pltpu.CompilerParams(
            dimension_semantics=("arbitrary",),            # layers are sequential
            vmem_limit_bytes=int(vmem_limit),
        ),
    )(x, gamma, beta, w, b)


def _reference(x, params):
    """Pure-JAX reference of the PyTorch forward (train-mode BN, biased variance)."""
    h = x
    for gamma, beta, w, b in params:
        mean = jnp.mean(h, axis=0, keepdims=True)
        var = jnp.mean((h - mean) ** 2, axis=0, keepdims=True)
        h = (h - mean) / jnp.sqrt(var + EPS) * gamma + beta
        h = jnp.maximum(h, 0.0)
        h = h @ w.T + b
    return h + x


def _make_params(key, D, depth):
    keys = jax.random.split(key, 4 * depth)
    params = []
    bound = 1.0 / jnp.sqrt(D)
    for layer in range(depth):
        kg, kb, kw, kbias = keys[4 * layer: 4 * (layer + 1)]
        gamma = 1.0 + 0.1 * jax.random.normal(kg, (D,), dtype=jnp.float32)
        beta = 0.1 * jax.random.normal(kb, (D,), dtype=jnp.float32)
        # nn.Linear default init: U(-1/sqrt(D), 1/sqrt(D))
        w = jax.random.uniform(kw, (D, D), jnp.float32, -bound, bound)
        bias = jax.random.uniform(kbias, (D,), jnp.float32, -bound, bound)
        params.append((gamma, beta, w, bias))
    return params


if __name__ == "__main__":
    key = jax.random.PRNGKey(0)
    N, D = 8, 128                      # batch=8, input_dim=128
    kx, kp1, kp3 = jax.random.split(key, 3)
    x = jax.random.normal(kx, (N, D), dtype=jnp.float32)

    # NOTE: the kernel reproduces the forward output only; PyTorch train-mode BN's
    # running_mean / running_var state update is a side effect not modeled here.

    # depth = 1 (module default), f32 matmul path
    params1 = _make_params(kp1, D, depth=1)
    out1 = resblock_forward(x, params1)
    jax.block_until_ready(out1)
    ref1 = _reference(x, params1)
    assert out1.shape == x.shape and out1.dtype == x.dtype
    assert jnp.allclose(out1, ref1, atol=1e-4, rtol=1e-4), "depth=1 f32 mismatch"

    # depth = 3, f32 matmul path (exercises the fused multi-layer grid + VMEM-resident h)
    params3 = _make_params(kp3, D, depth=3)
    out3 = resblock_forward(x, params3)
    jax.block_until_ready(out3)
    ref3 = _reference(x, params3)
    assert jnp.allclose(out3, ref3, atol=1e-4, rtol=1e-4), "depth=3 f32 mismatch"

    # depth = 3, bf16 MXU inputs with f32 accumulation (v6e/v7x fast path; looser tol)
    out3_bf16 = resblock_forward(x, params3, matmul_dtype=jnp.bfloat16)
    jax.block_until_ready(out3_bf16)
    assert jnp.allclose(out3_bf16, ref3, atol=1e-1, rtol=1e-1), "depth=3 bf16 mismatch"

    print("KERNEL_OK")
</pallas_src>

<mosaic_0001>
module attributes {stable_mosaic.version = 11 : i64} {
  func.func @_resblock_fused_kernel(%arg0: i32, %arg1: memref<8x128xf32, #tpu.memory_space<vmem>>, %arg2: memref<1x128xf32, #tpu.memory_space<vmem>>, %arg3: memref<1x128xf32, #tpu.memory_space<vmem>>, %arg4: memref<1x128x128xf32, #tpu.memory_space<vmem>>, %arg5: memref<1x128xf32, #tpu.memory_space<vmem>>, %arg6: memref<8x128xf32, #tpu.memory_space<vmem>>, %arg7: memref<8x128xf32, #tpu.memory_space<vmem>>) attributes {dimension_semantics = [#tpu.dimension_semantics<arbitrary>], iteration_bounds = array<i64: 1>, scalar_prefetch = 0 : i64, scratch_operands = 1 : i64, tpu.core_type = #tpu.core_type<tc>, window_params = [{pipeline_mode = #tpu.pipeline_mode<synchronous>, transform_indices = @transform_0, window_bounds = array<i64: 8, 128>}, {transform_indices = @transform_1, window_bounds = array<i64: 1, 128>}, {transform_indices = @transform_2, window_bounds = array<i64: 1, 128>}, {transform_indices = @transform_3, window_bounds = array<i64: 1, 128, 128>}, {transform_indices = @transform_4, window_bounds = array<i64: 1, 128>}, {pipeline_mode = #tpu.pipeline_mode<synchronous>, transform_indices = @transform_5, window_bounds = array<i64: 8, 128>}]} {
    %c0_i32 = arith.constant 0 : i32
    %0 = arith.cmpi eq, %arg0, %c0_i32 : i32
    %1 = arith.extui %0 : i1 to i32
    %c0_i32_0 = arith.constant 0 : i32
    %2 = arith.cmpi ne, %1, %c0_i32_0 : i32
    scf.if %2 {
      %c0_22 = arith.constant 0 : index
      %c0_23 = arith.constant 0 : index
      %41 = vector.load %arg1[%c0_22, %c0_23] : memref<8x128xf32, #tpu.memory_space<vmem>>, vector<8x128xf32>
      %c0_24 = arith.constant 0 : index
      %c0_25 = arith.constant 0 : index
      %42 = vector.load %arg7[%c0_24, %c0_25] : memref<8x128xf32, #tpu.memory_space<vmem>>, vector<8x128xf32>
      tpu.vector_store %arg7[%c0_24, %c0_25], %41 {strides = array<i32>} : memref<8x128xf32, #tpu.memory_space<vmem>>, vector<8x128xf32>,
    } else {
    }
    %c0 = arith.constant 0 : index
    %c0_1 = arith.constant 0 : index
    %3 = vector.load %arg7[%c0, %c0_1] : memref<8x128xf32, #tpu.memory_space<vmem>>, vector<8x128xf32>
    %cst = arith.constant dense<0.000000e+00> : vector<128xf32>
    %4 = vector.multi_reduction <add>, %3, %cst [0] : vector<8x128xf32> to vector<128xf32>
    %5 = vector.shape_cast %4 : vector<128xf32> to vector<1x128xf32>
    %cst_2 = arith.constant 1.250000e-01 : f32
    %6 = vector.broadcast %cst_2 : f32 to vector<1x128xf32>
    %7 = arith.mulf %5, %6 : vector<1x128xf32>
    %8 = arith.mulf %3, %3 : vector<8x128xf32>
    %cst_3 = arith.constant dense<0.000000e+00> : vector<128xf32>
    %9 = vector.multi_reduction <add>, %8, %cst_3 [0] : vector<8x128xf32> to vector<128xf32>
    %10 = vector.shape_cast %9 : vector<128xf32> to vector<1x128xf32>
    %cst_4 = arith.constant 1.250000e-01 : f32
    %11 = vector.broadcast %cst_4 : f32 to vector<1x128xf32>
    %12 = arith.mulf %10, %11 : vector<1x128xf32>
    %13 = arith.mulf %7, %7 : vector<1x128xf32>
    %14 = arith.subf %12, %13 : vector<1x128xf32>
    %cst_5 = arith.constant 0.000000e+00 : f32
    %15 = vector.broadcast %cst_5 : f32 to vector<1x128xf32>
    %16 = arith.maximumf %14, %15 : vector<1x128xf32>
    %cst_6 = arith.constant 9.99999974E-6 : f32
    %17 = vector.broadcast %cst_6 : f32 to vector<1x128xf32>
    %18 = arith.addf %16, %17 : vector<1x128xf32>
    %19 = math.rsqrt %18 : vector<1x128xf32>
    %c0_7 = arith.constant 0 : index
    %c0_8 = arith.constant 0 : index
    %20 = vector.load %arg2[%c0_7, %c0_8] : memref<1x128xf32, #tpu.memory_space<vmem>>, vector<1x128xf32>
    %21 = arith.mulf %20, %19 : vector<1x128xf32>
    %c0_9 = arith.constant 0 : index
    %c0_10 = arith.constant 0 : index
    %22 = vector.load %arg3[%c0_9, %c0_10] : memref<1x128xf32, #tpu.memory_space<vmem>>, vector<1x128xf32>
    %23 = arith.mulf %7, %21 : vector<1x128xf32>
    %24 = arith.subf %22, %23 : vector<1x128xf32>
    %25 = vector.broadcast %21 : vector<1x128xf32> to vector<8x128xf32>
    %26 = arith.mulf %3, %25 : vector<8x128xf32>
    %27 = vector.broadcast %24 : vector<1x128xf32> to vector<8x128xf32>
    %28 = arith.addf %26, %27 : vector<8x128xf32>
    %cst_11 = arith.constant 0.000000e+00 : f32
    %29 = vector.broadcast %cst_11 : f32 to vector<8x128xf32>
    %30 = arith.maximumf %28, %29 : vector<8x128xf32>
    %c0_12 = arith.constant 0 : index
    %c0_13 = arith.constant 0 : index
    %c0_14 = arith.constant 0 : index
    %31 = vector.load %arg4[%c0_12, %c0_13, %c0_14] : memref<1x128x128xf32, #tpu.memory_space<vmem>>, vector<1x128x128xf32>
    %32 = vector.shape_cast %31 : vector<1x128x128xf32> to vector<128x128xf32>
    %cst_15 = arith.constant dense<0.000000e+00> : vector<8x128xf32>
    %33 = tpu.matmul %30, %32, %cst_15 {dimension_numbers = #tpu.dot_dimension_numbers<[1], [1], [0], [0], [0, 0, 1, 0], [], []>} : vector<8x128xf32>, vector<128x128xf32>, vector<8x128xf32> -> vector<8x128xf32>
    %c0_16 = arith.constant 0 : index
    %c0_17 = arith.constant 0 : index
    %34 = vector.load %arg5[%c0_16, %c0_17] : memref<1x128xf32, #tpu.memory_space<vmem>>, vector<1x128xf32>
    %35 = vector.broadcast %34 : vector<1x128xf32> to vector<8x128xf32>
    %36 = arith.addf %33, %35 : vector<8x128xf32>
    %c0_18 = arith.constant 0 : index
    %c0_19 = arith.constant 0 : index
    %37 = vector.load %arg7[%c0_18, %c0_19] : memref<8x128xf32, #tpu.memory_space<vmem>>, vector<8x128xf32>
    tpu.vector_store %arg7[%c0_18, %c0_19], %36 {strides = array<i32>} : memref<8x128xf32, #tpu.memory_space<vmem>>, vector<8x128xf32>,
    %c0_i32_20 = arith.constant 0 : i32
    %38 = arith.cmpi eq, %arg0, %c0_i32_20 : i32
    %39 = arith.extui %38 : i1 to i32
    %c0_i32_21 = arith.constant 0 : i32
    %40 = arith.cmpi ne, %39, %c0_i32_21 : i32
    scf.if %40 {
      %c0_22 = arith.constant 0 : index
      %c0_23 = arith.constant 0 : index
      %41 = vector.load %arg1[%c0_22, %c0_23] : memref<8x128xf32, #tpu.memory_space<vmem>>, vector<8x128xf32>
      %42 = arith.addf %36, %41 : vector<8x128xf32>
      %c0_24 = arith.constant 0 : index
      %c0_25 = arith.constant 0 : index
      %43 = vector.load %arg6[%c0_24, %c0_25] : memref<8x128xf32, #tpu.memory_space<vmem>>, vector<8x128xf32>
      tpu.vector_store %arg6[%c0_24, %c0_25], %42 {strides = array<i32>} : memref<8x128xf32, #tpu.memory_space<vmem>>, vector<8x128xf32>,
    } else {
    }
    return
  }
  func.func @transform_0(%arg0: i32) -> (i32, i32) {
    %c0_i32 = arith.constant 0 : i32
    %c0_i32_0 = arith.constant 0 : i32
    %c0_i32_1 = arith.constant 0 : i32
    return %c0_i32, %c0_i32_0 : i32, i32
  }
  func.func @transform_1(%arg0: i32) -> (i32, i32) {
    %c0_i32 = arith.constant 0 : i32
    %c0_i32_0 = arith.constant 0 : i32
    return %arg0, %c0_i32 : i32, i32
  }
  func.func @transform_2(%arg0: i32) -> (i32, i32) {
    %c0_i32 = arith.constant 0 : i32
    %c0_i32_0 = arith.constant 0 : i32
    return %arg0, %c0_i32 : i32, i32
  }
  func.func @transform_3(%arg0: i32) -> (i32, i32, i32) {
    %c0_i32 = arith.constant 0 : i32
    %c0_i32_0 = arith.constant 0 : i32
    %c0_i32_1 = arith.constant 0 : i32
    return %arg0, %c0_i32, %c0_i32_0 : i32, i32, i32
  }
  func.func @transform_4(%arg0: i32) -> (i32, i32) {
    %c0_i32 = arith.constant 0 : i32
    %c0_i32_0 = arith.constant 0 : i32
    return %arg0, %c0_i32 : i32, i32
  }
  func.func @transform_5(%arg0: i32) -> (i32, i32) {
    %c0_i32 = arith.constant 0 : i32
    %c0_i32_0 = arith.constant 0 : i32
    %c0_i32_1 = arith.constant 0 : i32
    return %c0_i32, %c0_i32_0 : i32, i32
  }
}

</mosaic_0001>

<bundles_post_ra>
// kernel: tpu_custom_call.1
= control target key start
LH: loop header
LB: loop body
LE: loop exit
PB: predicated region body
PF: predicated region fallthrough
CT: control target
= control target key end

     0   :  { %10 = vsyncpa [#allocation4], 0  ;;  %s352_s0 = inlined_call_operand.hbm [shape: f32[8,128], index: 0, kind: input, shape index: {}]   ;;  %s353_s1 = inlined_call_operand.hbm [shape: f32[1,128], index: 1, kind: input, shape index: {}]   ;;  %s354_s2 = inlined_call_operand.vmem [shape: f32[1,128], index: 2, kind: input, shape index: {}]   ;;  %s355_s3 = inlined_call_operand.hbm [shape: f32[1,128,128], index: 3, kind: input, shape index: {}]   ;;  %s356_s4 = inlined_call_operand.vmem [shape: f32[1,128], index: 4, kind: input, shape index: {}]   ;;  %s357_s5 = inlined_call_operand.hbm [shape: f32[8,128], index: 5, kind: output, shape index: {}]  }
   0x1   :  { %11 = vsyncpa [#allocation7], 0  ;;  %s29_s20 = sshll.u32 %s353_s1, 4  ;;  %s30_s20 = int_to_ptr.hbm [resolvable:$true] %s29_s20 }
   0x2   :  { %12 = vsyncpa [#allocation5], 0  ;;  %s290_s21 = smov [#allocation6]   ;;  %s18_s25 = sshll.u32 %s352_s0, 4  ;;  %s19_s25 = int_to_ptr.hbm [resolvable:$true] %s18_s25 }
   0x3   :  { %s31_s22 = sshll.u32 %s290_s21, 4  ;;  %s291_s26 = smov [#allocation3]   ;;  %s32_s22 = int_to_ptr.vmem [resolvable:$true] %s31_s22 }
   0x4   :  { %34 = dma.hbm_to_vmem [thread:$0]  %s30_s20, 16, %s32_s22, [#allocation7]  }
   0x5   :  { %s20_s27 = sshll.u32 %s291_s26, 4  ;;  %s41_s30 = sshll.u32 %s355_s3, 4  ;;  %s21_s27 = int_to_ptr.vmem [resolvable:$true] %s20_s27  ;;  %s42_s30 = int_to_ptr.hbm [resolvable:$true] %s41_s30 }
   0x6   :  { %23 = dma.hbm_to_vmem [thread:$0]  %s19_s25, 128, %s21_s27, [#allocation4]  }
   0x7   :  { %s292_s1 = smov [#allocation8]   ;;  %s293_s7 = smov 128  }
   0x8   :  { %s43_s6 = sshll.u32 %s292_s1, 4  ;;  %s294_s8 = smov 8   ;;  %s44_s6 = int_to_ptr.vmem [resolvable:$true] %s43_s6 }
   0x9   :  { %49 = dma.hbm_to_vmem [thread:$0]  %s42_s30, 2048, %s44_s6, [#allocation7], %s293_s7, %s293_s7, %s294_s8  }
   0xa   :  { %284 = dma.done.wait [#allocation4], 128  }
   0xb   :  { %285 = vsyncadd [#allocation4], 4294967168 }
   0xc   :  { %286 = dma.done.wait [#allocation7], 2064  }
   0xd   :  { %287 = vsyncadd [#allocation7], 4294965232  ;;  %v129_v0 = vld [vmem:[#allocation8 + $0x78] sm:$0xff]  ;;  %v128_v1 = vld [vmem:[#allocation8 + $0x70] sm:$0xff]  ;;  %s168_s14 = sshll.u32 %s357_s5, 4  ;;  %s169_s14 = int_to_ptr.hbm [resolvable:$true] %s168_s14 }
   0xe   :  { %134 = vmatpush.xpose.msra.mxu0 %v129_v0  ;;  %v335_v2 = vld [vmem:[#allocation3] sm:$0xff]  ;;  %v127_v5 = vld [vmem:[#allocation8 + $0x68] sm:$0xff]  ;;  %v126_v10 = vld [vmem:[#allocation8 + $0x60] sm:$0xff] }
   0xf   :  { %v71_v3 = vrot.slane %v335_v2, 4  ;;  %v78_v4 = vmul.f32 %v335_v2, %v335_v2  ;;  %v125_v15 = vld [vmem:[#allocation8 + $0x58] sm:$0xff]  ;;  %v124_v20 = vld [vmem:[#allocation8 + $0x50] sm:$0xff]  ;;  %v123_v24 = vld [vmem:[#allocation8 + $0x48] sm:$0xff] }
  0x10   :  { %v122_v27 = vld [vmem:[#allocation8 + $0x40] sm:$0xff]  ;;  %v121_v28 = vld [vmem:[#allocation8 + $0x38] sm:$0xff]  ;;  %v120_v31 = vld [vmem:[#allocation8 + $0x30] sm:$0xff] }
  0x11   :  { %v72_v6 = vadd.f32 %v71_v3, %v335_v2  ;;  %v79_v7 = vrot.slane %v78_v4, 4  ;;  %v119_v34 = vld [vmem:[#allocation8 + $0x28] sm:$0xff]  ;;  %v100_v37 = vld [vmem:[#allocation6] sm:$0x1]  ;;  %v118_v38 = vld [vmem:[#allocation8 + $0x20] sm:$0xff] }
  0x12   :  { %135 = vmatpush.xpose.msra.mxu0 %v128_v1  ;;  %v102_v41 = vld [vmem:[%s354_s2] sm:$0x1]  ;;  %v117_v42 = vld [vmem:[#allocation8 + $0x18] sm:$0xff]  ;;  %v115_v49 = vld [vmem:[#allocation8 + $0x8] sm:$0xff]  ;;  %s295_s2 = smov [#allocation9]  }
  0x13   :  { %v73_v8 = vrot.slane %v72_v6, 2  ;;  %v80_v9 = vadd.f32 %v79_v7, %v78_v4  ;;  %v116_v46 = vld [vmem:[#allocation8 + $0x10] sm:$0xff]  ;;  %v114_v51 = vld [vmem:[#allocation8] sm:$0xff]  ;;  %s166_s11 = sshll.u32 %s295_s2, 4  ;;  %s167_s11 = int_to_ptr.vmem [resolvable:$true] %s166_s11 }
  0x14   :  { %v185_v53 = vld [vmem:[%s356_s4] ss:$0 sm:$0xff] }
  0x15   :  { %v74_v11 = vadd.f32 %v73_v8, %v72_v6  ;;  %v81_v12 = vrot.slane %v80_v9, 2 }
  0x16   :  { %136 = vmatpush.xpose.msra.mxu0 %v127_v5 }
  0x17   :  { %v75_v13 = vrot.slane %v74_v11, 1  ;;  %v82_v14 = vadd.f32 %v81_v12, %v80_v9 }
  0x19   :  { %v76_v16 = vadd.f32 %v75_v13, %v74_v11  ;;  %v83_v17 = vrot.slane %v82_v14, 1 }
  0x1a   :  { %137 = vmatpush.xpose.msra.mxu0 %v126_v10 }
  0x1b   :  { %v77_v18 = vmul.f32 0.125, %v76_v16  ;;  %v84_v19 = vadd.f32 %v83_v17, %v82_v14 }
  0x1d   :  { %v85_v21 = vmul.f32 0.125, %v84_v19  ;;  %v86_v22 = vmul.f32 %v77_v18, %v77_v18 }
  0x1e   :  { %138 = vmatpush.xpose.msra.mxu0 %v125_v15 }
  0x1f   :  { %v87_v23 = vsub.f32 %v85_v21, %v86_v22 }
  0x21   :  { %v88_v25 = vmax.f32 %v87_v23, 0.0 }
  0x22   :  { %139 = vmatpush.xpose.msra.mxu0 %v124_v20 }
  0x23   :  { %v89_v26 = vadd.f32 1e-05, %v88_v25 }
  0x25   :  { %186 = vrsqrt.f32 %v89_v26  ;;  %vm96_vm0 = vweird.f32 %v89_v26 }
  0x26   :  { %140 = vmatpush.xpose.msra.mxu0 %v123_v24 }
  0x2a   :  { %141 = vmatpush.xpose.msra.mxu0 %v122_v27 }
  0x2b   :  { %v187_v29 = vpop.eup %186 }
  0x2c   :  { %v91_v30 = vmul.f32 %v187_v29, %v89_v26  ;;  %vm97_vm1 = vweird.f32 %v187_v29 }
  0x2d   :  { %vm98_vm2 = vmor %vm96_vm0, %vm97_vm1 }
  0x2e   :  { %142 = vmatpush.xpose.msra.mxu0 %v121_v28  ;;  %v92_v32 = vmul.f32 %v187_v29, %v91_v30 }
  0x30   :  { %v93_v33 = vmul.f32 0.5, %v92_v32 }
  0x32   :  { %143 = vmatpush.xpose.msra.mxu0 %v120_v31  ;;  %v94_v35 = vsub.f32 1.5, %v93_v33 }
  0x34   :  { %v95_v36 = vmul.f32 %v187_v29, %v94_v35 }
  0x36   :  { %144 = vmatpush.xpose.msra.mxu0 %v119_v34  ;;  %v99_v39 = vsel %vm98_vm2, %v187_v29, %v95_v36 }
  0x37   :  { %v101_v40 = vmul.f32 %v100_v37, %v99_v39 }
  0x39   :  { %v103_v43 = vmul.f32 %v101_v40, %v77_v18  ;;  %v106_v45 = vperm.slane %v101_v40, 0 }
  0x3a   :  { %145 = vmatpush.xpose.msra.mxu0 %v118_v38 }
  0x3b   :  { %v104_v44 = vsub.f32 %v102_v41, %v103_v43  ;;  %v108_v47 = vmul.f32 %v106_v45, %v335_v2 }
  0x3d   :  { %v110_v48 = vperm.slane %v104_v44, 0 }
  0x3e   :  { %146 = vmatpush.xpose.msra.mxu0 %v117_v42 }
  0x3f   :  { %v112_v50 = vadd.f32 %v110_v48, %v108_v47 }
  0x41   :  { %v113_v52 = vmax.f32 %v112_v50, 0.0 }
  0x42   :  { %147 = vmatpush.xpose.msra.mxu0 %v116_v46 }
  0x46   :  { %148 = vmatpush.xpose.msra.mxu0 %v115_v49 }
  0x4a   :  { %149 = vmatpush.xpose.msra.mxu0 %v114_v51 }
  0x4d   :  { %150 = vmatmul.f32.vlgmr.msra.gmra.mxu0 %v113_v52 }
  0xca   :  { %v151_v54 = vpop.f32.mrf.mxu0 }
  0xcb   :  { %v152_v55 = vadd.f32 %v185_v53, %v151_v54 }
  0xcd   :  { %v159_v56 = vadd.f32 %v152_v55, %v335_v2 }
  0xcf   :  { %160 = vst [vmem:[#allocation9] sm:$0xff] %v159_v56 }
  0xd0   :  { %171 = dma.vmem_to_hbm [thread:$0]  %s167_s11, 128, %s169_s14, [#allocation5]  }
  0xd1   :  { %288 = dma.done.wait [#allocation5], 128  }
  0xd2   :  { %289 = vsyncadd [#allocation5], 4294967168 }
  0xd3   :  { %176 = vsyncpa [#allocation4], 1 }
  0xd4   :  { %177 = vsyncpa [#allocation7], 1 }
  0xd5   :  { %178 = vsyncpa [#allocation5], 1 }

</bundles_post_ra>
